<compile_context>
chip_gen: v7x
topology: tpu7x:2x2x1
jax: 0.10.0
libtpu: 0.0.40
codegen_flags: <defaults>
</compile_context>

<pallas_src>
import jax
import jax.numpy as jnp
from jax.experimental import pallas as pl
from jax.experimental.pallas import tpu as pltpu

LANES = 128
PALLAS_MIN_ELEMS = 64 * 1024  # below this, a fused XLA FMA beats a custom call


def _max_tile_rows() -> int:
    """Generation-dependent row tile (rows of 128 f32 lanes per block)."""
    try:
        kind = jax.devices()[0].device_kind.lower()
    except Exception:
        return 2048
    if "v7" in kind:
        return 8192  # 4 MiB block; in+out double-buffered = 16 MiB < 32 MiB scoped
    if "v6" in kind:
        return 4096  # 2 MiB block; well under v6e's 32 MiB scoped default
    return 2048      # v5e & others: 1 MiB block; safe under 16 MiB scoped default


def _choose_tile_rows(rows_total: int, max_tile_r: int) -> int:
    """Multiple of 8, <= rows_total, capped per generation; prefer >=2 grid steps."""
    t = min(max_tile_r, (rows_total // 8) * 8)
    if rows_total // t < 2:
        half = (rows_total // 2 // 8) * 8
        if half >= 8:
            t = min(t, half)  # split so both v7x TensorCores get a block
    return t


def _affine_kernel(w_ref, b_ref, x_ref, o_ref):
    # w_ref / b_ref: scalar-prefetch refs in SMEM, shape (1,).
    # x_ref / o_ref: (tile_r, 128) VMEM tiles; one fused multiply-add per vreg.
    o_ref[...] = x_ref[...] * w_ref[0] + b_ref[0]


def _affine_pallas(x2d: jax.Array, w: jax.Array, b: jax.Array, tile_r: int) -> jax.Array:
    """Run y = x*w + b over a lane-dense (rows, 128) f32 slab."""
    rows = x2d.shape[0]
    grid = (pl.cdiv(rows, tile_r),)  # partial last block handled by Pallas masking
    return pl.pallas_call(
        _affine_kernel,
        out_shape=jax.ShapeDtypeStruct((rows, LANES), jnp.float32),
        grid_spec=pltpu.PrefetchScalarGridSpec(
            num_scalar_prefetch=2,  # w, b land in SMEM; passed to index_maps too
            grid=grid,
            in_specs=[pl.BlockSpec((tile_r, LANES), lambda i, w_r, b_r: (i, 0))],
            out_specs=pl.BlockSpec((tile_r, LANES), lambda i, w_r, b_r: (i, 0)),
        ),
        compiler_params=pltpu.CompilerParams(
            dimension_semantics=("parallel",),
        ),
        cost_estimate=pl.CostEstimate(
            flops=2 * rows * LANES,
            transcendentals=0,
            bytes_accessed=8 * rows * LANES,  # 4B read + 4B write per element
        ),
    )(w, b, x2d)


def linear_forward(x: jax.Array, weight: jax.Array, bias: jax.Array,
                   *, force_pallas: bool = False) -> jax.Array:
    """x: (N, 1) float32, weight: (1, 1), bias: (1,) -> (N, 1) float32."""
    n = x.shape[0]
    x_flat = jnp.ravel(x).astype(jnp.float32)
    w_s = weight.reshape(()).astype(jnp.float32)
    b_s = bias.reshape(()).astype(jnp.float32)

    # ---- tiny-workload fast path: let XLA fuse the affine (no custom call) ----
    if n < PALLAS_MIN_ELEMS and not force_pallas:
        return (x_flat * w_s + b_s).reshape(n, 1)

    w = weight.reshape(1).astype(jnp.float32)
    b = bias.reshape(1).astype(jnp.float32)
    max_tile_r = _max_tile_rows()
    rows_total = n // LANES

    if rows_total < 8:
        # Forced-tiny path (demo / testing only): pad to one (8,128) block.
        rows_pad = 8
        padded = rows_pad * LANES
        x2d = jnp.pad(x_flat, (0, padded - n)).reshape(rows_pad, LANES)
        out2d = _affine_pallas(x2d, w, b, tile_r=rows_pad)
        return out2d.reshape(padded)[:n].reshape(n, 1)

    # ---- bulk: largest 128-aligned prefix, lane-dense view, no padding ----
    n_bulk = rows_total * LANES
    tile_r = _choose_tile_rows(rows_total, max_tile_r)
    bulk2d = x_flat[:n_bulk].reshape(rows_total, LANES)  # free reshape, no copy pass
    out_bulk = _affine_pallas(bulk2d, w, b, tile_r).reshape(n_bulk)

    n_tail = n - n_bulk
    if n_tail == 0:
        return out_bulk.reshape(n, 1)

    # Ragged tail (< 128 elements): plain XLA FMA, fuses with its consumer.
    out_tail = x_flat[n_bulk:] * w_s + b_s
    return jnp.concatenate([out_bulk, out_tail]).reshape(n, 1)


if __name__ == "__main__":
    # Deterministic parameter init (nn.Linear(1, 1): weight (1,1), bias (1,)).
    key = jax.random.PRNGKey(0)
    kw, kb = jax.random.split(key)
    # PyTorch default init: U(-1/sqrt(fan_in), 1/sqrt(fan_in)) with fan_in = 1.
    weight = jax.random.uniform(kw, (1, 1), jnp.float32, minval=-1.0, maxval=1.0)
    bias = jax.random.uniform(kb, (1,), jnp.float32, minval=-1.0, maxval=1.0)

    # Input mirrors the script: torch.arange(0, 3, 0.02).unsqueeze(1) -> (150, 1)
    x = jnp.arange(0.0, 3.0, 0.02, dtype=jnp.float32)[:, None]
    ref = x @ weight.T + bias

    # 1) Default dispatch: tiny N takes the fused-XLA fast path.
    out_fast = jax.block_until_ready(linear_forward(x, weight, bias))
    assert out_fast.shape == (150, 1)
    assert jnp.allclose(out_fast, ref, atol=1e-6), "fast path mismatch"

    # 2) Pallas kernel (forced) on the module's actual (150, 1) input.
    out_k = jax.block_until_ready(linear_forward(x, weight, bias, force_pallas=True))
    assert out_k.shape == (150, 1)
    assert jnp.allclose(out_k, ref, atol=1e-6), "pallas (tiny) mismatch"

    # 3) Pallas bulk path: partial last grid block + ragged tail + concat.
    x2 = (jnp.arange(2000, dtype=jnp.float32) * 0.01)[:, None]
    ref2 = x2 @ weight.T + bias
    out2 = jax.block_until_ready(linear_forward(x2, weight, bias, force_pallas=True))
    assert out2.shape == (2000, 1)
    assert jnp.allclose(out2, ref2, atol=1e-5), "pallas (bulk) mismatch"

    print("KERNEL_OK")
</pallas_src>

<mosaic_0001>
module attributes {stable_mosaic.version = 11 : i64} {
  func.func @_affine_kernel(%arg0: i32, %arg1: memref<1xf32, #tpu.memory_space<smem>>, %arg2: memref<1xf32, #tpu.memory_space<smem>>, %arg3: memref<8x128xf32, #tpu.memory_space<vmem>>, %arg4: memref<8x128xf32, #tpu.memory_space<vmem>>) attributes {dimension_semantics = [#tpu.dimension_semantics<parallel>], iteration_bounds = array<i64: 1>, scalar_prefetch = 2 : i64, scratch_operands = 0 : i64, tpu.core_type = #tpu.core_type<tc>, window_params = [{transform_indices = @transform_0, window_bounds = array<i64: 8, 128>}, {transform_indices = @transform_1, window_bounds = array<i64: 8, 128>}]} {
    %c0 = arith.constant 0 : index
    %c0_0 = arith.constant 0 : index
    %0 = vector.load %arg3[%c0, %c0_0] : memref<8x128xf32, #tpu.memory_space<vmem>>, vector<8x128xf32>
    %c0_1 = arith.constant 0 : index
    %1 = memref.load %arg1[%c0_1] : memref<1xf32, #tpu.memory_space<smem>>
    %2 = vector.broadcast %1 : f32 to vector<8x128xf32>
    %3 = arith.mulf %0, %2 : vector<8x128xf32>
    %c0_2 = arith.constant 0 : index
    %4 = memref.load %arg2[%c0_2] : memref<1xf32, #tpu.memory_space<smem>>
    %5 = vector.broadcast %4 : f32 to vector<8x128xf32>
    %6 = arith.addf %3, %5 : vector<8x128xf32>
    %c0_3 = arith.constant 0 : index
    %c0_4 = arith.constant 0 : index
    %7 = vector.load %arg4[%c0_3, %c0_4] : memref<8x128xf32, #tpu.memory_space<vmem>>, vector<8x128xf32>
    tpu.vector_store %arg4[%c0_3, %c0_4], %6 {strides = array<i32>} : memref<8x128xf32, #tpu.memory_space<vmem>>, vector<8x128xf32>,
    return
  }
  func.func @transform_0(%arg0: i32, %arg1: memref<1xf32, #tpu.memory_space<smem>>, %arg2: memref<1xf32, #tpu.memory_space<smem>>) -> (i32, i32) {
    %c0_i32 = arith.constant 0 : i32
    %c0_i32_0 = arith.constant 0 : i32
    return %arg0, %c0_i32 : i32, i32
  }
  func.func @transform_1(%arg0: i32, %arg1: memref<1xf32, #tpu.memory_space<smem>>, %arg2: memref<1xf32, #tpu.memory_space<smem>>) -> (i32, i32) {
    %c0_i32 = arith.constant 0 : i32
    %c0_i32_0 = arith.constant 0 : i32
    return %arg0, %c0_i32 : i32, i32
  }
}

</mosaic_0001>

<bundles_post_ra>
// kernel: tpu_custom_call.1
= control target key start
LH: loop header
LB: loop body
LE: loop exit
PB: predicated region body
PF: predicated region fallthrough
CT: control target
= control target key end

     0   :  { %10 = vsyncpa [#allocation6], 0  ;;  %s150_s0 = inlined_call_operand.<no memory space> [shape: f32[1], index: 0, kind: input, shape index: {}]   ;;  %s151_s1 = inlined_call_operand.<no memory space> [shape: f32[1], index: 1, kind: input, shape index: {}]   ;;  %s152_s2 = inlined_call_operand.hbm [shape: f32[8,128], index: 2, kind: input, shape index: {}]   ;;  %s153_s3 = inlined_call_operand.hbm [shape: f32[8,128], index: 3, kind: output, shape index: {}]  }
   0x1   :  { %11 = vsyncpa [#allocation7], 0  ;;  %s98_s12 = smov [#allocation5]   ;;  %s50_s16 = scalar_lea.hbm %s152_s2, 128 }
   0x2   :  { %s18_s13 = sshll.u32 %s98_s12, 4  ;;  %p51_p0 = scmp.ne.s32.totalorder %s152_s2, %s50_s16  ;;  %s19_s13 = int_to_ptr.vmem [resolvable:$true] %s18_s13 }
   0x3   :  { %p54_p1 = scmp.lt.u32.totalorder %s50_s16, %s152_s2 }
   0x5   :  { %p56_p2 = pnand %p54_p1, %p51_p0 }
   0x7   :  { %59 = shalt.err (!%p56_p2)
}
   0x8   :  { %s60_s21 = scalar_lea.vmem %s19_s13, 128  ;;  %p65_p4 = scmp.lt.s32.totalorder %s19_s13, %s19_s13 }
   0x9   :  { %p61_p3 = scmp.ne.s32.totalorder %s19_s13, %s60_s21  ;;  %p66_p5 = scmp.lt.s32.totalorder %s60_s21, %s60_s21 }
   0xb   :  { %p67_p6 = por %p66_p5, %p65_p4 }
   0xd   :  { %p68_p7 = pnand %p67_p6, %p61_p3 }
   0xf   :  { %71 = shalt.err (!%p68_p7)
}
  0x10   :  { %21 = dma.hbm_to_vmem [thread:$0]  %s152_s2, 128, %s19_s13, [#allocation6]  }
  0x11   :  { %94 = dma.done.wait [#allocation6], 128  }
  0x12   :  { %95 = vsyncadd [#allocation6], 4294967168  ;;  %v27_v0 = vstv %s150_s0  ;;  %v25_v1 = vld [vmem:[#allocation5] sm:$0xff]  ;;  %v30_v2 = vstv %s151_s1  ;;  %s99_s28 = smov [#allocation8]  }
  0x13   :  { %s39_s29 = sshll.u32 %s99_s28, 4  ;;  %v28_v3 = vmul.f32 %v27_v0, %v25_v1  ;;  %s40_s29 = int_to_ptr.vmem [resolvable:$true] %s39_s29 }
  0x14   :  { %s72_s30 = scalar_lea.vmem %s40_s29, 128  ;;  %p77_p9 = scmp.lt.s32.totalorder %s40_s29, %s40_s29 }
  0x15   :  { %v31_v4 = vadd.f32 %v30_v2, %v28_v3  ;;  %p73_p8 = scmp.ne.s32.totalorder %s40_s29, %s72_s30  ;;  %p78_p10 = scmp.lt.s32.totalorder %s72_s30, %s72_s30 }
  0x17   :  { %32 = vst [vmem:[#allocation8] sm:$0xff] %v31_v4  ;;  %p79_p11 = por %p78_p10, %p77_p9 }
  0x19   :  { %p80_p12 = pnand %p79_p11, %p73_p8 }
  0x1b   :  { %83 = shalt.err (!%p80_p12)
}
  0x1c   :  { %s84_s4 = scalar_lea.hbm %s153_s3, 128 }
  0x1d   :  { %p85_p13 = scmp.ne.s32.totalorder %s153_s3, %s84_s4  ;;  %p88_p0 = scmp.lt.u32.totalorder %s84_s4, %s153_s3 }
  0x1f   :  { %p90_p1 = pnand %p88_p0, %p85_p13 }
  0x21   :  { %93 = shalt.err (!%p90_p1)
}
  0x22   :  { %42 = dma.vmem_to_hbm [thread:$0]  %s40_s29, 128, %s153_s3, [#allocation7]  }
  0x23   :  { %96 = dma.done.wait [#allocation7], 128  }
  0x24   :  { %97 = vsyncadd [#allocation7], 4294967168 }
  0x25   :  { %46 = vsyncpa [#allocation6], 1 }
  0x26   :  { %47 = vsyncpa [#allocation7], 1 }

</bundles_post_ra>
